<compile_context>
chip_gen: v6e
topology: v6e:2x2x1
jax: 0.10.0
libtpu: 0.0.40
codegen_flags: <defaults>
</compile_context>

<pallas_src>
import jax
import jax.numpy as jnp
from jax.experimental import pallas as pl
from jax.experimental.pallas import tpu as pltpu


def _round_up(x: int, m: int) -> int:
    return (x + m - 1) // m * m


def _mlp_kernel(bp_ref, ft_ref, w1a_ref, w1b_ref, b1_ref, w2_ref, b2_ref,
                w3_ref, b3_ref, o_ref):
    """One (TB,) batch tile: two Linear+ReLU layers plus the 1-unit head."""
    # ---- Layer 1: fused "concat" == split matmul over the two input chunks.
    ft_part = jnp.dot(ft_ref[...], w1b_ref[...],
                      preferred_element_type=jnp.float32)        # (TB, H) f32
    if bp_ref.shape[1] == 1:
        # K=1 contraction: broadcast multiply on the VPU beats a 1-deep MXU op.
        bp_part = bp_ref[...].astype(jnp.float32) * w1a_ref[...].astype(jnp.float32)
    else:
        bp_part = jnp.dot(bp_ref[...], w1a_ref[...],
                          preferred_element_type=jnp.float32)
    h1 = jnp.maximum(bp_part + ft_part + b1_ref[...], 0.0)        # f32 epilogue

    # ---- Layer 2: (TB, H) @ (H, H) on the MXU, f32 accumulation.
    h2 = jnp.dot(h1.astype(w2_ref.dtype), w2_ref[...],
                 preferred_element_type=jnp.float32) + b2_ref[...]
    h2 = jnp.maximum(h2, 0.0)

    # ---- Head (out_features = 1): VPU multiply + lane reduction, no MXU.
    w3f = w3_ref[...].astype(jnp.float32)                         # (1, H)
    out = jnp.sum(h2 * w3f, axis=-1, keepdims=True) + b3_ref[...]  # (TB, 1)
    o_ref[...] = out.astype(o_ref.dtype)


def meta_mlp_forward(base_pred, features, params, *, block_rows=512,
                     io_dtype=None):
    """base_pred: (B, P), features: (B, F) with P + F == input_size.

    io_dtype: optional narrower dtype (e.g. jnp.bfloat16) for activations and
    MXU weights (halves HBM traffic on v6e/v7x); accumulation and the
    elementwise epilogue stay float32.
    """
    B, P = base_pred.shape
    F = features.shape[1]
    H = params["w2"].shape[0]

    w1, b1, w2, b2, w3, b3 = (params["w1"], params["b1"], params["w2"],
                              params["b2"], params["w3"], params["b3"])
    # Split W1 so the base_pred/features concat never materializes in HBM.
    w1_bp, w1_ft = w1[:P], w1[P:]
    # Head weight as a (1, H) row for the in-kernel VPU reduction.
    w3_row = w3.reshape(1, H)

    if io_dtype is not None:
        cast = lambda a: a.astype(io_dtype)
        base_pred, features = cast(base_pred), cast(features)
        w1_bp, w1_ft, w2, w3_row = cast(w1_bp), cast(w1_ft), cast(w2), cast(w3_row)
        # Biases stay f32: they are added in the f32 post-matmul epilogue.

    # Batch tiling: TB rows per grid step (multiple of 8 sublanes); pad B up.
    tb = min(block_rows, _round_up(B, 8))
    b_pad = _round_up(B, tb)
    num_tiles = b_pad // tb
    if b_pad != B:
        pad = ((0, b_pad - B), (0, 0))
        base_pred = jnp.pad(base_pred, pad)
        features = jnp.pad(features, pad)

    resident = lambda a: pl.BlockSpec(a.shape, lambda i: (0, 0))  # DMA'd once

    out = pl.pallas_call(
        _mlp_kernel,
        out_shape=jax.ShapeDtypeStruct((b_pad, 1), jnp.float32),
        grid=(num_tiles,),
        in_specs=[
            pl.BlockSpec((tb, P), lambda i: (i, 0)),   # base_pred row tile
            pl.BlockSpec((tb, F), lambda i: (i, 0)),   # features  row tile
            resident(w1_bp), resident(w1_ft), resident(b1),
            resident(w2), resident(b2),
            resident(w3_row), resident(b3),
        ],
        out_specs=pl.BlockSpec((tb, 1), lambda i: (i, 0)),
        compiler_params=pltpu.CompilerParams(
            dimension_semantics=("parallel",)),        # megacore split on v7x
    )(base_pred, features, w1_bp, w1_ft, b1, w2, b2, w3_row, b3)

    return out[:B]


def init_params(key, input_size, hidden_size):
    """PyTorch-nn.Linear-style init (uniform +/- 1/sqrt(fan_in)).

    Weights are stored as (in_features, out_features) so the kernel does x @ W.
    """
    def linear(k, fan_in, fan_out):
        kw, kb = jax.random.split(k)
        bound = 1.0 / jnp.sqrt(fan_in)
        w = jax.random.uniform(kw, (fan_in, fan_out), jnp.float32, -bound, bound)
        b = jax.random.uniform(kb, (1, fan_out), jnp.float32, -bound, bound)
        return w, b

    k1, k2, k3 = jax.random.split(key, 3)
    w1, b1 = linear(k1, input_size, hidden_size)
    w2, b2 = linear(k2, hidden_size, hidden_size)
    w3, b3 = linear(k3, hidden_size, 1)
    return {"w1": w1, "b1": b1, "w2": w2, "b2": b2, "w3": w3, "b3": b3}


def _reference_forward(base_pred, features, params):
    x = jnp.concatenate([base_pred, features], axis=1)
    h1 = jnp.maximum(x @ params["w1"] + params["b1"], 0.0)
    h2 = jnp.maximum(h1 @ params["w2"] + params["b2"], 0.0)
    return h2 @ params["w3"] + params["b3"]


if __name__ == "__main__":
    # Small shapes consistent with the module's forward:
    #   base_pred: (B, 1), features: (B, 7)  ->  input_size = 8, hidden = 32
    B, P, F, HIDDEN = 8, 1, 7, 32
    INPUT_SIZE = P + F

    key = jax.random.PRNGKey(0)
    k_params, k_bp, k_ft, k_bp2, k_ft2 = jax.random.split(key, 5)

    params = init_params(k_params, INPUT_SIZE, HIDDEN)
    base_pred = jax.random.normal(k_bp, (B, P), jnp.float32)
    features = jax.random.normal(k_ft, (B, F), jnp.float32)

    out = jax.block_until_ready(meta_mlp_forward(base_pred, features, params))
    ref = jax.block_until_ready(_reference_forward(base_pred, features, params))
    assert out.shape == (B, 1)
    assert jnp.allclose(out, ref, atol=1e-4, rtol=1e-4)

    # Exercise the gridded / padded path: multiple batch tiles, B not a
    # multiple of the tile size, resident weights reused across grid steps.
    B2 = 300
    bp2 = jax.random.normal(k_bp2, (B2, P), jnp.float32)
    ft2 = jax.random.normal(k_ft2, (B2, F), jnp.float32)
    out2 = jax.block_until_ready(
        meta_mlp_forward(bp2, ft2, params, block_rows=128))
    ref2 = jax.block_until_ready(_reference_forward(bp2, ft2, params))
    assert out2.shape == (B2, 1)
    assert jnp.allclose(out2, ref2, atol=1e-4, rtol=1e-4)

    # bf16-I/O variant (v6e/v7x HBM-bandwidth optimization), f32 accumulation.
    out_bf16 = jax.block_until_ready(
        meta_mlp_forward(bp2, ft2, params, block_rows=128,
                         io_dtype=jnp.bfloat16))
    assert out_bf16.shape == (B2, 1)
    assert jnp.allclose(out_bf16, ref2, atol=5e-2, rtol=5e-2)

    print("KERNEL_OK")
</pallas_src>

<mosaic_0001>
module attributes {stable_mosaic.version = 11 : i64} {
  func.func @_mlp_kernel(%arg0: i32, %arg1: memref<8x1xf32, #tpu.memory_space<vmem>>, %arg2: memref<8x7xf32, #tpu.memory_space<vmem>>, %arg3: memref<1x32xf32, #tpu.memory_space<vmem>>, %arg4: memref<7x32xf32, #tpu.memory_space<vmem>>, %arg5: memref<1x32xf32, #tpu.memory_space<vmem>>, %arg6: memref<32x32xf32, #tpu.memory_space<vmem>>, %arg7: memref<1x32xf32, #tpu.memory_space<vmem>>, %arg8: memref<1x32xf32, #tpu.memory_space<vmem>>, %arg9: memref<1x1xf32, #tpu.memory_space<vmem>>, %arg10: memref<8x1xf32, #tpu.memory_space<vmem>>) attributes {dimension_semantics = [#tpu.dimension_semantics<parallel>], iteration_bounds = array<i64: 1>, scalar_prefetch = 0 : i64, scratch_operands = 0 : i64, tpu.core_type = #tpu.core_type<tc>, window_params = [{transform_indices = @transform_0, window_bounds = array<i64: 8, 1>}, {transform_indices = @transform_1, window_bounds = array<i64: 8, 7>}, {pipeline_mode = #tpu.pipeline_mode<synchronous>, transform_indices = @transform_2, window_bounds = array<i64: 1, 32>}, {pipeline_mode = #tpu.pipeline_mode<synchronous>, transform_indices = @transform_3, window_bounds = array<i64: 7, 32>}, {pipeline_mode = #tpu.pipeline_mode<synchronous>, transform_indices = @transform_4, window_bounds = array<i64: 1, 32>}, {pipeline_mode = #tpu.pipeline_mode<synchronous>, transform_indices = @transform_5, window_bounds = array<i64: 32, 32>}, {pipeline_mode = #tpu.pipeline_mode<synchronous>, transform_indices = @transform_6, window_bounds = array<i64: 1, 32>}, {pipeline_mode = #tpu.pipeline_mode<synchronous>, transform_indices = @transform_7, window_bounds = array<i64: 1, 32>}, {pipeline_mode = #tpu.pipeline_mode<synchronous>, transform_indices = @transform_8, window_bounds = array<i64: 1, 1>}, {transform_indices = @transform_9, window_bounds = array<i64: 8, 1>}]} {
    %c0 = arith.constant 0 : index
    %c0_0 = arith.constant 0 : index
    %0 = vector.load %arg2[%c0, %c0_0] : memref<8x7xf32, #tpu.memory_space<vmem>>, vector<8x7xf32>
    %c0_1 = arith.constant 0 : index
    %c0_2 = arith.constant 0 : index
    %1 = vector.load %arg4[%c0_1, %c0_2] : memref<7x32xf32, #tpu.memory_space<vmem>>, vector<7x32xf32>
    %cst = arith.constant dense<0.000000e+00> : vector<8x32xf32>
    %2 = tpu.matmul %0, %1, %cst {dimension_numbers = #tpu.dot_dimension_numbers<[1], [0], [0], [1], [0, 0, 1, 1], [], []>} : vector<8x7xf32>, vector<7x32xf32>, vector<8x32xf32> -> vector<8x32xf32>
    %c0_3 = arith.constant 0 : index
    %c0_4 = arith.constant 0 : index
    %3 = vector.load %arg1[%c0_3, %c0_4] : memref<8x1xf32, #tpu.memory_space<vmem>>, vector<8x1xf32>
    %c0_5 = arith.constant 0 : index
    %c0_6 = arith.constant 0 : index
    %4 = vector.load %arg3[%c0_5, %c0_6] : memref<1x32xf32, #tpu.memory_space<vmem>>, vector<1x32xf32>
    %5 = vector.broadcast %3 : vector<8x1xf32> to vector<8x32xf32>
    %6 = vector.broadcast %4 : vector<1x32xf32> to vector<8x32xf32>
    %7 = arith.mulf %5, %6 : vector<8x32xf32>
    %8 = arith.addf %7, %2 : vector<8x32xf32>
    %c0_7 = arith.constant 0 : index
    %c0_8 = arith.constant 0 : index
    %9 = vector.load %arg5[%c0_7, %c0_8] : memref<1x32xf32, #tpu.memory_space<vmem>>, vector<1x32xf32>
    %10 = vector.broadcast %9 : vector<1x32xf32> to vector<8x32xf32>
    %11 = arith.addf %8, %10 : vector<8x32xf32>
    %cst_9 = arith.constant 0.000000e+00 : f32
    %12 = vector.broadcast %cst_9 : f32 to vector<8x32xf32>
    %13 = arith.maximumf %11, %12 : vector<8x32xf32>
    %c0_10 = arith.constant 0 : index
    %c0_11 = arith.constant 0 : index
    %14 = vector.load %arg6[%c0_10, %c0_11] : memref<32x32xf32, #tpu.memory_space<vmem>>, vector<32x32xf32>
    %cst_12 = arith.constant dense<0.000000e+00> : vector<8x32xf32>
    %15 = tpu.matmul %13, %14, %cst_12 {dimension_numbers = #tpu.dot_dimension_numbers<[1], [0], [0], [1], [0, 0, 1, 1], [], []>} : vector<8x32xf32>, vector<32x32xf32>, vector<8x32xf32> -> vector<8x32xf32>
    %c0_13 = arith.constant 0 : index
    %c0_14 = arith.constant 0 : index
    %16 = vector.load %arg7[%c0_13, %c0_14] : memref<1x32xf32, #tpu.memory_space<vmem>>, vector<1x32xf32>
    %17 = vector.broadcast %16 : vector<1x32xf32> to vector<8x32xf32>
    %18 = arith.addf %15, %17 : vector<8x32xf32>
    %cst_15 = arith.constant 0.000000e+00 : f32
    %19 = vector.broadcast %cst_15 : f32 to vector<8x32xf32>
    %20 = arith.maximumf %18, %19 : vector<8x32xf32>
    %c0_16 = arith.constant 0 : index
    %c0_17 = arith.constant 0 : index
    %21 = vector.load %arg8[%c0_16, %c0_17] : memref<1x32xf32, #tpu.memory_space<vmem>>, vector<1x32xf32>
    %22 = vector.broadcast %21 : vector<1x32xf32> to vector<8x32xf32>
    %23 = arith.mulf %20, %22 : vector<8x32xf32>
    %cst_18 = arith.constant dense<0.000000e+00> : vector<8xf32>
    %24 = vector.multi_reduction <add>, %23, %cst_18 [1] : vector<8x32xf32> to vector<8xf32>
    %25 = vector.shape_cast %24 : vector<8xf32> to vector<8x1xf32>
    %c0_19 = arith.constant 0 : index
    %c0_20 = arith.constant 0 : index
    %26 = vector.load %arg9[%c0_19, %c0_20] : memref<1x1xf32, #tpu.memory_space<vmem>>, vector<1x1xf32>
    %27 = vector.broadcast %26 : vector<1x1xf32> to vector<8x1xf32>
    %28 = arith.addf %25, %27 : vector<8x1xf32>
    %c0_21 = arith.constant 0 : index
    %c0_22 = arith.constant 0 : index
    %29 = vector.load %arg10[%c0_21, %c0_22] : memref<8x1xf32, #tpu.memory_space<vmem>>, vector<8x1xf32>
    tpu.vector_store %arg10[%c0_21, %c0_22], %28 {strides = array<i32>} : memref<8x1xf32, #tpu.memory_space<vmem>>, vector<8x1xf32>,
    return
  }
  func.func @transform_0(%arg0: i32) -> (i32, i32) {
    %c0_i32 = arith.constant 0 : i32
    %c0_i32_0 = arith.constant 0 : i32
    return %arg0, %c0_i32 : i32, i32
  }
  func.func @transform_1(%arg0: i32) -> (i32, i32) {
    %c0_i32 = arith.constant 0 : i32
    %c0_i32_0 = arith.constant 0 : i32
    return %arg0, %c0_i32 : i32, i32
  }
  func.func @transform_2(%arg0: i32) -> (i32, i32) {
    %c0_i32 = arith.constant 0 : i32
    %c0_i32_0 = arith.constant 0 : i32
    %c0_i32_1 = arith.constant 0 : i32
    return %c0_i32, %c0_i32_0 : i32, i32
  }
  func.func @transform_3(%arg0: i32) -> (i32, i32) {
    %c0_i32 = arith.constant 0 : i32
    %c0_i32_0 = arith.constant 0 : i32
    %c0_i32_1 = arith.constant 0 : i32
    return %c0_i32, %c0_i32_0 : i32, i32
  }
  func.func @transform_4(%arg0: i32) -> (i32, i32) {
    %c0_i32 = arith.constant 0 : i32
    %c0_i32_0 = arith.constant 0 : i32
    %c0_i32_1 = arith.constant 0 : i32
    return %c0_i32, %c0_i32_0 : i32, i32
  }
  func.func @transform_5(%arg0: i32) -> (i32, i32) {
    %c0_i32 = arith.constant 0 : i32
    %c0_i32_0 = arith.constant 0 : i32
    %c0_i32_1 = arith.constant 0 : i32
    return %c0_i32, %c0_i32_0 : i32, i32
  }
  func.func @transform_6(%arg0: i32) -> (i32, i32) {
    %c0_i32 = arith.constant 0 : i32
    %c0_i32_0 = arith.constant 0 : i32
    %c0_i32_1 = arith.constant 0 : i32
    return %c0_i32, %c0_i32_0 : i32, i32
  }
  func.func @transform_7(%arg0: i32) -> (i32, i32) {
    %c0_i32 = arith.constant 0 : i32
    %c0_i32_0 = arith.constant 0 : i32
    %c0_i32_1 = arith.constant 0 : i32
    return %c0_i32, %c0_i32_0 : i32, i32
  }
  func.func @transform_8(%arg0: i32) -> (i32, i32) {
    %c0_i32 = arith.constant 0 : i32
    %c0_i32_0 = arith.constant 0 : i32
    %c0_i32_1 = arith.constant 0 : i32
    return %c0_i32, %c0_i32_0 : i32, i32
  }
  func.func @transform_9(%arg0: i32) -> (i32, i32) {
    %c0_i32 = arith.constant 0 : i32
    %c0_i32_0 = arith.constant 0 : i32
    return %arg0, %c0_i32 : i32, i32
  }
}

</mosaic_0001>

<bundles_post_ra>
// kernel: tpu_custom_call.1
= control target key start
LH: loop header
LB: loop body
LE: loop exit
PB: predicated region body
PF: predicated region fallthrough
CT: control target
= control target key end

     0   :  { %s447_s0 = inlined_call_operand.vmem [shape: f32[8,1], index: 0, kind: input, shape index: {}]   ;;  %s448_s1 = inlined_call_operand.vmem [shape: f32[8,7], index: 1, kind: input, shape index: {}]   ;;  %s449_s2 = inlined_call_operand.hbm [shape: f32[1,32], index: 2, kind: input, shape index: {}]   ;;  %s450_s3 = inlined_call_operand.vmem [shape: f32[7,32], index: 3, kind: input, shape index: {}]   ;;  %s451_s4 = inlined_call_operand.vmem [shape: f32[1,32], index: 4, kind: input, shape index: {}]   ;;  %s452_s5 = inlined_call_operand.hbm [shape: f32[32,32], index: 5, kind: input, shape index: {}]   ;;  %s453_s6 = inlined_call_operand.vmem [shape: f32[1,32], index: 6, kind: input, shape index: {}]   ;;  %s454_s7 = inlined_call_operand.vmem [shape: f32[1,32], index: 7, kind: input, shape index: {}]   ;;  %s455_s8 = inlined_call_operand.<no memory space> [shape: f32[1,1], index: 8, kind: input, shape index: {}]   ;;  %s456_s9 = inlined_call_operand.vmem [shape: f32[8,1], index: 9, kind: output, shape index: {}]  }
   0x1   :  { %v14_v0 = vstv %s455_s8 }
   0x2   :  { %15 = vst [vmem:[#allocation2] sm:$0x1] %v14_v0 }
   0x3   :  { %16 = vsyncpa [#allocation4], 0 }
   0x4   :  { %17 = vsyncpa [#allocation6], 0  ;;  %s360_s11 = smov [#allocation3]   ;;  %s361_s13 = smov [#allocation5]  }
   0x5   :  { %s28_s12 = sshll.u32 %s360_s11, 4  ;;  %s41_s14 = sshll.u32 %s361_s13, 4  ;;  %s29_s12 = int_to_ptr.vmem [resolvable:$true] %s28_s12  ;;  %s42_s14 = int_to_ptr.vmem [resolvable:$true] %s41_s14 }
   0x6   :  { %s324_s15 = scalar_lea.vmem %s29_s12, 16  ;;  %s328_s16 = scalar_lea.vmem %s29_s12, 32 }
   0x7   :  { %p325_p0 = scmp.ne.s32.totalorder %s29_s12, %s324_s15  ;;  %p329_p1 = scmp.lt.s32.totalorder %s29_s12, %s29_s12 }
   0x8   :  { %p330_p2 = scmp.lt.s32.totalorder %s328_s16, %s324_s15 }
   0xa   :  { %p331_p3 = por %p330_p2, %p329_p1 }
   0xc   :  { %p332_p4 = pnand %p331_p3, %p325_p0 }
   0xe   :  { %335 = shalt.err (!%p332_p4)
}
   0xf   :  { %31 = dma.hbm_to_vmem [thread:$0]  %s449_s2, 16, %s29_s12, [#allocation4]  }
  0x10   :  { %s344_s8 = scalar_lea.vmem %s42_s14, 512  ;;  %p349_p6 = scmp.lt.s32.totalorder %s42_s14, %s42_s14 }
  0x11   :  { %p345_p5 = scmp.ne.s32.totalorder %s42_s14, %s344_s8  ;;  %p350_p7 = scmp.lt.s32.totalorder %s344_s8, %s344_s8 }
  0x13   :  { %p351_p8 = por %p350_p7, %p349_p6 }
  0x15   :  { %p352_p9 = pnand %p351_p8, %p345_p5 }
  0x17   :  { %355 = shalt.err (!%p352_p9)
}
  0x18   :  { %s362_s19 = smov 128   ;;  %s363_s20 = smov 8  }
  0x19   :  { %47 = dma.hbm_to_vmem [thread:$0]  %s452_s5, 512, %s42_s14, [#allocation6], %s362_s19, %s362_s19, %s363_s20  }
  0x1a   :  { %356 = dma.done.wait [#allocation4], 16  }
  0x1b   :  { %357 = vsyncadd [#allocation4], 4294967280 }
  0x1c   :  { %358 = dma.done.wait [#allocation6], 512  }
  0x1d   :  { %359 = vsyncadd [#allocation6], 4294966784  ;;  %v364_v1 = vmov 0.0   ;;  %vm365_vm0 = vmmov 0   ;;  %v366_v2 = vmov 0   ;;  %vm66_vm1 = vcmask 1046528  }
  0x1e   :  { %292 = vmatprep.subr.mxu0 %v364_v1  ;;  %294 = vmatprep.mubr.msk.f32.mxu0 %vm365_vm0, %v364_v1  ;;  %vm62_vm2 = vcmask 56320   ;;  %v61_v3 = vld [vmem:[%s450_s3] sm:$0x7f]  ;;  %v166_v7 = vld [vmem:[#allocation5 + $0x10] sm:$0xff]  ;;  %v165_v8 = vld [vmem:[#allocation5 + $0x8] sm:$0xff]  ;;  %vm175_vm3 = vcmask 261120  }
  0x1f   :  { %315 = vset.pattern.permute.xlu0 %v366_v2  ;;  %297 = vmatprep.subr.mxu1 %v364_v1  ;;  %v60_v4 = vld [vmem:[%s448_s1] sm:$0xff]  ;;  %vm269_vm4 = vcmask 7168  }
  0x20   :  { %305 = vmatprep.mubr.msk.f32.mxu1 %vm365_vm0, %v364_v1  ;;  %v140_v5 = vld [vmem:[%s447_s0] sm:$0xff]  ;;  %293 = vmatpush3.msk.msra.mxu0 %vm66_vm1, %v61_v3 }
  0x21   :  { %144 = vperm.xlu0 %315, %v140_v5   ;;  %295 = vmatmul.mubr.msk.f32.vlgmr.msra.gmra.mxu0 %vm62_vm2, %v60_v4  ;;  %v167_v6 = vld [vmem:[#allocation5 + $0x18] sm:$0xff]  ;;  %v164_v9 = vld [vmem:[#allocation5] sm:$0xff] }
  0x22   :  { %298 = vmatpush3.msra.mxu1 %v167_v6  ;;  %v279_v10 = vld [vmem:[#allocation3] ss:$0 sm:$0xff]  ;;  %v280_v14 = vld [vmem:[%s451_s4] ss:$0 sm:$0xff] }
  0x23   :  { %299 = vmatprep.subr.mxu1 %v364_v1  ;;  %v281_v19 = vld [vmem:[%s453_s6] ss:$0 sm:$0xff] }
  0x24   :  { %300 = vmatpush3.msra.mxu1 %v166_v7  ;;  %v283_v23 = vld [vmem:[%s454_s7] ss:$0 sm:$0xff] }
  0x25   :  { %301 = vmatprep.subr.mxu1 %v364_v1  ;;  %v284_v27 = vld [vmem:[#allocation2] ss:$0 sm:$0xff] }
  0x26   :  { %302 = vmatpush3.msra.mxu1 %v165_v8 }
  0x27   :  { %303 = vmatprep.subr.mxu1 %v364_v1 }
  0x28   :  { %304 = vmatpush3.msra.mxu1 %v164_v9 }
  0x9c   :  { %v145_v11 = vpop.permute.xlu0 %144 }
  0x9d   :  { %v153_v12 = vmul.f32 %v279_v10, %v145_v11 }
  0xe1   :  { %v136_v13 = vpop.f32.mrf.mxu0 }
  0xe2   :  { %v154_v15 = vadd.f32 %v153_v12, %v136_v13 }
  0xe3   :  { %v296_v16 = vpop.f32.mrf.mxu0 }
  0xe4   :  { %v162_v17 = vadd.f32 %v280_v14, %v154_v15 }
  0xe6   :  { %v163_v18 = vmax.f32 %v162_v17, 0.0 }
  0xe8   :  { %306 = vmatmul.mubr.msk.f32.vlgmr.msra.gmra.mxu1 %vm175_vm3, %v163_v18 }
 0x1a8   :  { %v245_v20 = vpop.f32.mrf.mxu1 }
 0x1a9   :  { %v246_v21 = vadd.f32 %v281_v19, %v245_v20 }
 0x1aa   :  { %v307_v22 = vpop.f32.mrf.mxu1 }
 0x1ab   :  { %v249_v24 = vmax.f32 %v246_v21, 0.0 }
 0x1ad   :  { %v257_v25 = vmul.f32 %v283_v23, %v249_v24 }
 0x1af   :  { %v258_v26 = vsel %vm175_vm3, %v257_v25, 0.0 }
 0x1b0   :  { %259 = vadd.xlane.f32.xlu0 %v258_v26 }
 0x239   :  { %v260_v28 = vpop.xlane.xlu0 %259 }
 0x23a   :  { %v268_v29 = vadd.f32 %v284_v27, %v260_v28 }
 0x23c   :  { %270 = vst.msk [vmem:[%s456_s9] sm:$0xff] %vm269_vm4, %v268_v29 }
 0x23d   :  { %275 = vsyncpa [#allocation4], 1 }
 0x23e   :  { %276 = vsyncpa [#allocation6], 1 }

</bundles_post_ra>
